<compile_context>
chip_gen: v7x
topology: tpu7x:2x2x1
jax: 0.10.0
libtpu: 0.0.40
codegen_flags: <defaults>
</compile_context>

<pallas_src>
import functools

import jax
import jax.numpy as jnp
from jax.experimental import pallas as pl
from jax.experimental.pallas import tpu as pltpu


def _round_up(a, m):
    return ((a + m - 1) // m) * m


def _maxout_kernel(x_ref, o_ref, *, pool_size):
    """Grouped max over `pool_size` consecutive lane elements of the block."""
    x = x_ref[...]                                # (tn, wb), lane-dense load
    tn, w = x.shape
    g = w // pool_size
    # Reductions on packed sub-32-bit floats can hit unimplemented Mosaic
    # paths; compute in f32 (exact for max) and cast back on store.
    if jnp.issubdtype(x.dtype, jnp.floating) and x.dtype.itemsize < 4:
        x = x.astype(jnp.float32)
    # TODO(synk): an unrolled maximum over lane-strided slices (x[:, k::p])
    # would avoid the in-block relayout entirely, but lane-dim strided slices
    # are not reliably lowered by Mosaic, so keep the proven reshape+reduce.
    m = jnp.max(x.reshape(tn, g, pool_size), axis=-1)
    o_ref[...] = m.astype(o_ref.dtype)


def _choose_fold(rows, g, d, itemsize, budget, max_search=8192):
    """Smallest divisor f of `rows` making the folded output width f*g
    lane-dense (>=128, preferably a multiple of 128), while one folded
    (input + output) row still fits the double-buffered VMEM budget."""
    if g >= 128 or rows <= 1:
        return 1
    need = (128 + g - 1) // g
    divisors = [f for f in range(need, min(rows, max_search) + 1)
                if rows % f == 0]
    pick = None
    for f in divisors:                            # prefer exact 128-multiples
        if (f * g) % 128 == 0:
            pick = f
            break
    if pick is None and divisors:
        pick = divisors[0]
    if pick is None:
        return 1
    if 2 * pick * (d + g) * itemsize > budget:    # folded row too wide
        return 1
    return pick


def maxout(x, pool_size, *, block_budget_bytes=8 * 1024 * 1024,
           max_row_tile=1024):
    d = x.shape[-1]
    assert d % pool_size == 0, (
        'Wrong input last dim size ({}) for Maxout({})'.format(d, pool_size))
    g = d // pool_size
    lead = x.shape[:-1]
    rows = 1
    for s in lead:
        rows *= s

    ib = jnp.dtype(x.dtype).itemsize
    pack = max(8, 32 // ib)                       # sublane multiple: 8/16/32

    # ---- lane-dense 2-D view (R, W); groups stay `pool_size`-consecutive ----
    f = _choose_fold(rows, g, d, ib, block_budget_bytes)
    R = rows // f
    W = f * d
    Wo = f * g
    x2 = x.reshape(R, W)

    # ---- lane-axis blocking (only for extremely wide folded rows) ----
    if 2 * pack * (W + Wo) * ib <= block_budget_bytes:
        wb, n_wblocks = W, 1                      # full width: always legal
    else:
        unit = 128 * pool_size                    # keeps in/out widths 128-aligned
        units = max(1, block_budget_bytes
                    // (2 * pack * (unit + unit // pool_size) * ib))
        wb = min(units * unit, pl.cdiv(W, unit) * unit)
        n_wblocks = pl.cdiv(W, wb)
    wob = wb // pool_size

    # ---- row tile: largest dtype-aware tile fitting the VMEM budget ----
    tn = block_budget_bytes // (2 * (wb + wob) * ib)
    tn = max(1, min(tn, max_row_tile, R))
    if R >= 2 * pack:
        # keep >= 2 row blocks so multi-TensorCore chips can split the grid
        tn = min(tn, _round_up(pl.cdiv(R, 2), pack))
    if tn < R:
        tn = max(pack, (tn // pack) * pack)       # sublane-pack aligned
    n_rblocks = pl.cdiv(R, tn)                    # masked final block if needed

    out2 = pl.pallas_call(
        functools.partial(_maxout_kernel, pool_size=pool_size),
        out_shape=jax.ShapeDtypeStruct((R, Wo), x.dtype),
        grid_spec=pltpu.PrefetchScalarGridSpec(
            num_scalar_prefetch=0,
            grid=(n_rblocks, n_wblocks),
            in_specs=[pl.BlockSpec((tn, wb), lambda i, j: (i, j))],
            out_specs=pl.BlockSpec((tn, wob), lambda i, j: (i, j)),
        ),
        compiler_params=pltpu.CompilerParams(
            dimension_semantics=("parallel", "parallel"),
            vmem_limit_bytes=32 * 1024 * 1024,
        ),
    )(x2)

    return out2.reshape(*lead, g)


if __name__ == "__main__":
    key = jax.random.PRNGKey(0)
    k1, k2, k3 = jax.random.split(key, 3)

    # primary small shape consistent with the decoder module: (batch=2, seq=8, hidden=32)
    pool_size = 4
    x = jax.random.normal(k1, (2, 8, 32), dtype=jnp.float32)
    out = jax.block_until_ready(maxout(x, pool_size))
    ref = jnp.max(x.reshape(2, 8, 32 // pool_size, pool_size), axis=-1)
    assert out.shape == (2, 8, 8), out.shape
    assert jnp.allclose(out, ref), "f32 mismatch vs reference"

    # exercise the cdiv / masked-final-row-block path (rows not divisible by tile)
    xb = jax.random.normal(k2, (5, 4, 512), dtype=jnp.float32)
    outb = jax.block_until_ready(maxout(xb, pool_size))
    refb = jnp.max(xb.reshape(5, 4, 128, 4), axis=-1)
    assert outb.shape == (5, 4, 128), outb.shape
    assert jnp.allclose(outb, refb), "masked-block mismatch vs reference"

    # exercise the dtype-aware (bf16) tiling path
    xc = jax.random.normal(k3, (2, 8, 64), dtype=jnp.float32).astype(jnp.bfloat16)
    outc = jax.block_until_ready(maxout(xc, 2))
    refc = jnp.max(xc.reshape(2, 8, 32, 2), axis=-1)
    assert outc.shape == (2, 8, 32), outc.shape
    assert jnp.allclose(outc.astype(jnp.float32), refc.astype(jnp.float32)), \
        "bf16 mismatch vs reference"

    print("KERNEL_OK")
</pallas_src>

<mosaic_0001>
module attributes {stable_mosaic.version = 11 : i64} {
  func.func @_maxout_kernel(%arg0: i32, %arg1: i32, %arg2: memref<1x512xf32, #tpu.memory_space<vmem>>, %arg3: memref<1x128xf32, #tpu.memory_space<vmem>>) attributes {dimension_semantics = [#tpu.dimension_semantics<parallel>, #tpu.dimension_semantics<parallel>], iteration_bounds = array<i64: 1, 1>, scalar_prefetch = 0 : i64, scratch_operands = 0 : i64, tpu.core_type = #tpu.core_type<tc>, window_params = [{transform_indices = @transform_0, window_bounds = array<i64: 1, 512>}, {transform_indices = @transform_1, window_bounds = array<i64: 1, 128>}]} {
    %c0 = arith.constant 0 : index
    %c0_0 = arith.constant 0 : index
    %0 = vector.load %arg2[%c0, %c0_0] : memref<1x512xf32, #tpu.memory_space<vmem>>, vector<1x512xf32>
    %1 = vector.shape_cast %0 : vector<1x512xf32> to vector<1x128x4xf32>
    %cst = arith.constant dense<0xFF800000> : vector<1x128xf32>
    %2 = vector.multi_reduction <maximumf>, %1, %cst [2] : vector<1x128x4xf32> to vector<1x128xf32>
    %c0_1 = arith.constant 0 : index
    %c0_2 = arith.constant 0 : index
    %3 = vector.load %arg3[%c0_1, %c0_2] : memref<1x128xf32, #tpu.memory_space<vmem>>, vector<1x128xf32>
    tpu.vector_store %arg3[%c0_1, %c0_2], %2 {strides = array<i32>} : memref<1x128xf32, #tpu.memory_space<vmem>>, vector<1x128xf32>,
    return
  }
  func.func @transform_0(%arg0: i32, %arg1: i32) -> (i32, i32) {
    %c0_i32 = arith.constant 0 : i32
    return %arg0, %arg1 : i32, i32
  }
  func.func @transform_1(%arg0: i32, %arg1: i32) -> (i32, i32) {
    %c0_i32 = arith.constant 0 : i32
    return %arg0, %arg1 : i32, i32
  }
}

</mosaic_0001>

<bundles_post_ra>
// kernel: tpu_custom_call.1
= control target key start
LH: loop header
LB: loop body
LE: loop exit
PB: predicated region body
PF: predicated region fallthrough
CT: control target
= control target key end

     0   :  { %6 = vsyncpa [#allocation3], 0  ;;  %s1663_s0 = inlined_call_operand.hbm [shape: f32[1,512], index: 0, kind: input, shape index: {}]   ;;  %s1664_s1 = inlined_call_operand.hbm [shape: f32[1,128], index: 1, kind: output, shape index: {}]  }
   0x1   :  { %7 = vsyncpa [#allocation4], 0  ;;  %s1256_s6 = smov [#allocation2]   ;;  %s1208_s10 = scalar_lea.hbm %s1663_s0, 64 }
   0x2   :  { %s14_s7 = sshll.u32 %s1256_s6, 4  ;;  %p1209_p0 = scmp.ne.s32.totalorder %s1663_s0, %s1208_s10  ;;  %s15_s7 = int_to_ptr.vmem [resolvable:$true] %s14_s7 }
   0x3   :  { %p1212_p1 = scmp.lt.u32.totalorder %s1208_s10, %s1663_s0 }
   0x5   :  { %p1214_p2 = pnand %p1212_p1, %p1209_p0 }
   0x7   :  { %1217 = shalt.err (!%p1214_p2)
}
   0x8   :  { %s1218_s15 = scalar_lea.vmem %s15_s7, 64  ;;  %p1223_p4 = scmp.lt.s32.totalorder %s15_s7, %s15_s7 }
   0x9   :  { %p1219_p3 = scmp.ne.s32.totalorder %s15_s7, %s1218_s15  ;;  %p1224_p5 = scmp.lt.s32.totalorder %s1218_s15, %s1218_s15 }
   0xb   :  { %p1225_p6 = por %p1224_p5, %p1223_p4 }
   0xd   :  { %p1226_p7 = pnand %p1225_p6, %p1219_p3 }
   0xf   :  { %1229 = shalt.err (!%p1226_p7)
}
  0x10   :  { %17 = dma.hbm_to_vmem [thread:$0]  %s1663_s0, 64, %s15_s7, [#allocation3]  }
  0x11   :  { %1252 = dma.done.wait [#allocation3], 64  }
  0x12   :  { %1253 = vsyncadd [#allocation3], 4294967232  ;;  %v1312_v0 = vld [vmem:[#allocation2] sm:$0xf]  ;;  %s1257_s18 = smov 124   ;;  %s1258_s19 = smov 116   ;;  %v1665_v3 = vlaneseq }
  0x13   :  { %24 = vrot.lane.b32.xlu0 %v1312_v0, %s1257_s18  ;;  %30 = vrot.lane.b32.xlu1 %v1312_v0, %s1258_s19  ;;  %s1259_s20 = smov 120   ;;  %s1260_s21 = smov 112   ;;  %v1288_v1 = vmov 1966171168   ;;  %v23_v8 = vrot.slane %v1312_v0, 1  ;;  %v117_v10 = vrot.slane %v1312_v0, 2 }
  0x14   :  { %s1261_s22 = smov 108   ;;  %s1262_s0 = smov 104   ;;  %v186_v2 = vunpack.c.l.s4 %v1288_v1  ;;  %v1346_v7 = vshrl.u32 %v1665_v3, 7  ;;  %v149_v12 = vrot.slane %v1312_v0, 3  ;;  %vm981_vm0 = vcmask 31744  }
  0x15   :  { %s1263_s23 = smov 100   ;;  %s1264_s24 = smov 96   ;;  %vm1057_vm1 = vcmask 130112   ;;  %vm1064_vm2 = vcmask 195712   ;;  %vm1071_vm3 = vcmask 261312   ;;  %vm1078_vm4 = vcmask 326912  }
  0x16   :  { %s1265_s25 = smov 92   ;;  %s1266_s26 = smov 88   ;;  %v187_v6 = vunpack.c.0.s8 %v186_v2  ;;  %vm1085_vm5 = vcmask 392512   ;;  %vm1092_vm6 = vcmask 458112   ;;  %vm1099_vm7 = vcmask 523712  }
  0x17   :  { %27 = vrot.lane.b32.xlu0 %v1312_v0, %s1259_s20  ;;  %33 = vrot.lane.b32.xlu1 %v1312_v0, %s1260_s21  ;;  %s1267_s27 = smov 84   ;;  %s1268_s28 = smov 80   ;;  %vm1106_vm8 = vcmask 589312   ;;  %vm1113_vm9 = vcmask 654912   ;;  %vm1120_vm10 = vcmask 720512   ;;  %vm1127_vm11 = vcmask 786112  }
  0x18   :  { %s1269_s29 = smov 76   ;;  %s1270_s30 = smov 72   ;;  %v1352_v16 = vsub.s32 %v187_v6, %v1346_v7  ;;  %vm1134_vm12 = vcmask 851712   ;;  %vm1141_vm13 = vcmask 917312   ;;  %vm1148_vm14 = vcmask 982912  }
  0x19   :  { %s1271_s2 = smov 68   ;;  %s1272_s3 = smov 64   ;;  %vm1155_vm15 = vcmask 1048512  }
  0x1a   :  { %s1273_s4 = smov 60   ;;  %s1274_s5 = smov 56  }
  0x1b   :  { %36 = vrot.lane.b32.xlu0 %v1312_v0, %s1261_s22  ;;  %39 = vrot.lane.b32.xlu1 %v1312_v0, %s1262_s0  ;;  %s1275_s6 = smov 52   ;;  %s1276_s7 = smov 48  }
  0x1c   :  { %s1277_s8 = smov 44   ;;  %s1278_s9 = smov 40  }
  0x1d   :  { %s1279_s10 = smov 36   ;;  %s1280_s11 = smov 32  }
  0x1e   :  { %s1281_s12 = smov 28   ;;  %s1282_s13 = smov 24  }
  0x1f   :  { %42 = vrot.lane.b32.xlu0 %v1312_v0, %s1263_s23  ;;  %45 = vrot.lane.b32.xlu1 %v1312_v0, %s1264_s24  ;;  %s1283_s14 = smov 20   ;;  %s1284_s15 = smov 16  }
  0x20   :  { %s1285_s16 = smov 12   ;;  %s1286_s17 = smov 8  }
  0x21   :  { %s1287_s18 = smov 4   ;;  %s1289_s19 = smov [#allocation5]  }
  0x22   :  { %s1165_s20 = sshll.u32 %s1289_s19, 4  ;;  %s1166_s20 = int_to_ptr.vmem [resolvable:$true] %s1165_s20 }
  0x23   :  { %48 = vrot.lane.b32.xlu0 %v1312_v0, %s1265_s25  ;;  %51 = vrot.lane.b32.xlu1 %v1312_v0, %s1266_s26  ;;  %s1230_s21 = scalar_lea.vmem %s1166_s20, 16  ;;  %s1234_s22 = scalar_lea.vmem %s1166_s20, 32 }
  0x24   :  { %p1231_p8 = scmp.ne.s32.totalorder %s1166_s20, %s1230_s21  ;;  %p1235_p9 = scmp.lt.s32.totalorder %s1166_s20, %s1166_s20 }
  0x25   :  { %p1236_p10 = scmp.lt.s32.totalorder %s1234_s22, %s1230_s21 }
  0x27   :  { %54 = vrot.lane.b32.xlu0 %v1312_v0, %s1267_s27  ;;  %57 = vrot.lane.b32.xlu1 %v1312_v0, %s1268_s28  ;;  %p1237_p11 = por %p1236_p10, %p1235_p9 }
  0x29   :  { %p1238_p12 = pnand %p1237_p11, %p1231_p8 }
  0x2b   :  { %60 = vrot.lane.b32.xlu0 %v1312_v0, %s1269_s29  ;;  %63 = vrot.lane.b32.xlu1 %v1312_v0, %s1270_s30 }
  0x2f   :  { %66 = vrot.lane.b32.xlu0 %v1312_v0, %s1271_s2  ;;  %69 = vrot.lane.b32.xlu1 %v1312_v0, %s1272_s3 }
  0x33   :  { %72 = vrot.lane.b32.xlu0 %v1312_v0, %s1273_s4  ;;  %75 = vrot.lane.b32.xlu1 %v1312_v0, %s1274_s5 }
  0x37   :  { %78 = vrot.lane.b32.xlu0 %v1312_v0, %s1275_s6  ;;  %81 = vrot.lane.b32.xlu1 %v1312_v0, %s1276_s7 }
  0x3b   :  { %84 = vrot.lane.b32.xlu0 %v1312_v0, %s1277_s8  ;;  %87 = vrot.lane.b32.xlu1 %v1312_v0, %s1278_s9 }
  0x3f   :  { %90 = vrot.lane.b32.xlu0 %v1312_v0, %s1279_s10  ;;  %93 = vrot.lane.b32.xlu1 %v1312_v0, %s1280_s11 }
  0x43   :  { %96 = vrot.lane.b32.xlu0 %v1312_v0, %s1281_s12  ;;  %99 = vrot.lane.b32.xlu1 %v1312_v0, %s1282_s13 }
  0x47   :  { %102 = vrot.lane.b32.xlu0 %v1312_v0, %s1283_s14  ;;  %105 = vrot.lane.b32.xlu1 %v1312_v0, %s1284_s15 }
  0x4b   :  { %108 = vrot.lane.b32.xlu0 %v1312_v0, %s1285_s16  ;;  %111 = vrot.lane.b32.xlu1 %v1312_v0, %s1286_s17 }
  0x4f   :  { %114 = vrot.lane.b32.xlu0 %v1312_v0, %s1287_s18 }
  0x85   :  { %v25_v4 = vpop.permute.xlu0 %24  ;;  %v31_v5 = vpop.permute.xlu1 %30 }
  0x86   :  { %v26_v9 = vrot.slane %v25_v4, 1  ;;  %v118_v11 = vrot.slane %v25_v4, 2  ;;  %v150_v13 = vrot.slane %v25_v4, 3  ;;  %v181_v17 = vcombine.low %v1312_v0, %v25_v4 }
  0x87   :  { %v32_v20 = vrot.slane %v31_v5, 1  ;;  %v120_v21 = vrot.slane %v31_v5, 2  ;;  %v152_v24 = vrot.slane %v31_v5, 3 }
  0x88   :  { %v377_v19 = vcombine.low %v23_v8, %v26_v9  ;;  %v573_v23 = vcombine.low %v117_v10, %v118_v11  ;;  %v1355_v27 = vcombine.low %v149_v12, %v150_v13  ;;  %v191_v31 = vrot.slane %v181_v17, %v1352_v16 }
  0x89   :  { %v28_v14 = vpop.permute.xlu0 %27  ;;  %v34_v15 = vpop.permute.xlu1 %33 }
  0x8a   :  { %v182_v18 = vcombine.low %v28_v14, %v31_v5  ;;  %v29_v22 = vrot.slane %v28_v14, 1  ;;  %v119_v25 = vrot.slane %v28_v14, 2  ;;  %v151_v26 = vrot.slane %v28_v14, 3 }
  0x8b   :  { %v35_v32 = vrot.slane %v34_v15, 1  ;;  %v121_v33 = vrot.slane %v34_v15, 2  ;;  %v153_v36 = vrot.slane %v34_v15, 3  ;;  %v387_v38 = vrot.slane %v377_v19, %v1352_v16 }
  0x8c   :  { %v198_v28 = vrot.slane %v182_v18, %v1352_v16  ;;  %v378_v35 = vcombine.low %v29_v22, %v32_v20  ;;  %v574_v39 = vcombine.low %v119_v25, %v120_v21  ;;  %v1360_v40 = vcombine.low %v151_v26, %v152_v24 }
  0x8d   :  { %v37_v29 = vpop.permute.xlu0 %36  ;;  %v40_v30 = vpop.permute.xlu1 %39  ;;  %v583_v42 = vrot.slane %v573_v23, %v1352_v16  ;;  %v779_v48 = vrot.slane %v1355_v27, %v1352_v16 }
  0x8e   :  { %v38_v34 = vrot.slane %v37_v29, 1  ;;  %v183_v37 = vcombine.low %v34_v15, %v37_v29  ;;  %v122_v41 = vrot.slane %v37_v29, 2  ;;  %v154_v43 = vrot.slane %v37_v29, 3 }
  0x8f   :  { %v41_v44 = vrot.slane %v40_v30, 1  ;;  %v213_v47 = vcombine.low %v191_v31, %v198_v28  ;;  %v123_v50 = vrot.slane %v40_v30, 2  ;;  %v155_v54 = vrot.slane %v40_v30, 3 }
  0x90   :  { %v379_v49 = vcombine.low %v35_v32, %v38_v34  ;;  %v205_v53 = vrot.slane %v183_v37, %v1352_v16  ;;  %v575_v57 = vcombine.low %v121_v33, %v122_v41  ;;  %v394_v59 = vrot.slane %v378_v35, %v1352_v16 }
  0x91   :  { %v43_v45 = vpop.permute.xlu0 %42  ;;  %v46_v46 = vpop.permute.xlu1 %45  ;;  %v590_v60 = vrot.slane %v574_v39, %v1352_v16  ;;  %v1369_v61 = vcombine.low %v153_v36, %v154_v43  ;;  %v221_v1 = vrot.slane %v213_v47, %v1352_v16  ;;  %v786_v2 = vrot.slane %v1360_v40, %v1352_v16 }
  0x92   :  { %v44_v51 = vrot.slane %v43_v45, 1  ;;  %v184_v52 = vcombine.low %v40_v30, %v43_v45  ;;  %v124_v55 = vrot.slane %v43_v45, 2  ;;  %v156_v56 = vrot.slane %v43_v45, 3 }
  0x93   :  { %v47_v4 = vrot.slane %v46_v46, 1  ;;  %v125_v5 = vrot.slane %v46_v46, 2  ;;  %v157_v6 = vrot.slane %v46_v46, 3  ;;  %v401_v8 = vrot.slane %v379_v49, %v1352_v16 }
  0x94   :  { %v212_v58 = vrot.slane %v184_v52, %v1352_v16  ;;  %v380_v62 = vcombine.low %v41_v44, %v44_v51  ;;  %v576_v9 = vcombine.low %v123_v50, %v124_v55  ;;  %v1375_v10 = vcombine.low %v155_v54, %v156_v56 }
  0x95   :  { %v49_v63 = vpop.permute.xlu0 %48  ;;  %v52_v0 = vpop.permute.xlu1 %51  ;;  %v409_v14 = vcombine.low %v387_v38, %v394_v59  ;;  %v597_v15 = vrot.slane %v575_v57, %v1352_v16  ;;  %v1378_v17 = vcombine.low %v583_v42, %v590_v60  ;;  %v793_v23 = vrot.slane %v1369_v61, %v1352_v16 }
  0x96   :  { %v230_v11 = vcombine.low %v46_v46, %v49_v63  ;;  %v214_v12 = vcombine.low %v205_v53, %v212_v58  ;;  %v50_v13 = vrot.slane %v49_v63, 1  ;;  %v126_v18 = vrot.slane %v49_v63, 2 }
  0x97   :  { %v408_v22 = vrot.slane %v380_v62, %v1352_v16  ;;  %v158_v24 = vrot.slane %v49_v63, 3  ;;  %v53_v25 = vrot.slane %v52_v0, 1  ;;  %v127_v26 = vrot.slane %v52_v0, 2 }
  0x98   :  { %v228_v21 = vrot.slane %v214_v12, %v1352_v16  ;;  %v240_v29 = vrot.slane %v230_v11, %v1352_v16  ;;  %v159_v30 = vrot.slane %v52_v0, 3  ;;  %v1385_v33 = vcombine.low %v47_v4, %v50_v13 }
  0x99   :  { %v55_v19 = vpop.permute.xlu0 %54  ;;  %v58_v20 = vpop.permute.xlu1 %57  ;;  %v604_v36 = vrot.slane %v576_v9, %v1352_v16  ;;  %v1388_v37 = vcombine.low %v125_v5, %v126_v18  ;;  %v410_v43 = vcombine.low %v401_v8, %v408_v22  ;;  %v1392_v44 = vcombine.low %v157_v6, %v158_v24 }
  0x9a   :  { %v231_v28 = vcombine.low %v52_v0, %v55_v19  ;;  %v56_v31 = vrot.slane %v55_v19, 1  ;;  %v229_v32 = vcombine.low %v221_v1, %v228_v21  ;;  %v128_v34 = vrot.slane %v55_v19, 2 }
  0x9b   :  { %v160_v35 = vrot.slane %v55_v19, 3  ;;  %v59_v45 = vrot.slane %v58_v20, 1  ;;  %v129_v46 = vrot.slane %v58_v20, 2  ;;  %v417_v47 = vrot.slane %v409_v14, %v1352_v16 }
  0x9c   :  { %v247_v38 = vrot.slane %v231_v28, %v1352_v16  ;;  %v982_v39 = vsel %vm981_vm0, %v229_v32, -inf  ;;  %v1395_v49 = vcombine.low %v53_v25, %v56_v31  ;;  %v161_v50 = vrot.slane %v58_v20, 3 }
  0x9d   :  { %v61_v41 = vpop.permute.xlu0 %60  ;;  %v64_v42 = vpop.permute.xlu1 %63  ;;  %983 = vmax.xlane.f32.xlu1 %v982_v39  ;;  %v1397_v53 = vcombine.low %v127_v26, %v128_v34  ;;  %v1399_v54 = vcombine.low %v159_v30, %v160_v35  ;;  %v606_v56 = vcombine.low %v597_v15, %v604_v36  ;;  %v424_v62 = vrot.slane %v410_v43, %v1352_v16 }
  0x9e   :  { %v62_v51 = vrot.slane %v61_v41, 1  ;;  %v232_v52 = vcombine.low %v58_v20, %v61_v41  ;;  %v130_v55 = vrot.slane %v61_v41, 2  ;;  %v162_v57 = vrot.slane %v61_v41, 3 }
  0x9f   :  { %v262_v60 = vcombine.low %v240_v29, %v247_v38  ;;  %v613_v63 = vrot.slane %v1378_v17, %v1352_v16  ;;  %v65_v0 = vrot.slane %v64_v42, 1  ;;  %v131_v1 = vrot.slane %v64_v42, 2 }
  0xa0   :  { %v254_v6 = vrot.slane %v232_v52, %v1352_v16  ;;  %v1405_v8 = vcombine.low %v59_v45, %v62_v51  ;;  %v163_v9 = vrot.slane %v64_v42, 3  ;;  %v1407_v12 = vcombine.low %v129_v46, %v130_v55 }
  0xa1   :  { %v67_v58 = vpop.permute.xlu0 %66  ;;  %v70_v59 = vpop.permute.xlu1 %69  ;;  %v425_v15 = vcombine.low %v417_v47, %v424_v62  ;;  %v1410_v18 = vcombine.low %v161_v50, %v162_v57  ;;  %v270_v20 = vrot.slane %v262_v60, %v1352_v16  ;;  %v620_v21 = vrot.slane %v606_v56, %v1352_v16 }
  0xa2   :  { %v68_v4 = vrot.slane %v67_v58, 1  ;;  %v233_v5 = vcombine.low %v64_v42, %v67_v58  ;;  %v132_v11 = vrot.slane %v67_v58, 2  ;;  %v164_v13 = vrot.slane %v67_v58, 3 }
  0xa3   :  { %v436_v22 = vrot.slane %v1385_v33, %v1352_v16  ;;  %v71_v25 = vrot.slane %v70_v59, 1  ;;  %v133_v26 = vrot.slane %v70_v59, 2  ;;  %v165_v28 = vrot.slane %v70_v59, 3 }
  0xa4   :  { %v261_v14 = vrot.slane %v233_v5, %v1352_v16  ;;  %v429_v24 = vcombine.low %v65_v0, %v68_v4  ;;  %v1416_v29 = vcombine.low %v131_v1, %v132_v11  ;;  %v1418_v34 = vcombine.low %v163_v9, %v164_v13 }
  0xa5   :  { %v73_v19 = vpop.permute.xlu0 %72  ;;  %v76_v17 = vpop.permute.xlu1 %75  ;;  %v1421_v38 = vsel %vm981_vm0, %v425_v15, -inf  ;;  %v621_v42 = vcombine.low %v613_v63, %v620_v21  ;;  %v443_v43 = vrot.slane %v1395_v49, %v1352_v16  ;;  %v450_v45 = vrot.slane %v1405_v8, %v1352_v16 }
  0xa6   :  { %v74_v30 = vrot.slane %v73_v19, 1  ;;  %v279_v31 = vcombine.low %v70_v59, %v73_v19  ;;  %v263_v32 = vcombine.low %v254_v6, %v261_v14  ;;  %v134_v35 = vrot.slane %v73_v19, 2 }
  0xa7   :  { %v166_v36 = vrot.slane %v73_v19, 3  ;;  %v77_v46 = vrot.slane %v76_v17, 1  ;;  %v135_v47 = vrot.slane %v76_v17, 2  ;;  %v167_v50 = vrot.slane %v76_v17, 3 }
  0xa8   :  { %v277_v33 = vrot.slane %v263_v32, %v1352_v16  ;;  %v289_v52 = vrot.slane %v279_v31, %v1352_v16  ;;  %v475_v55 = vcombine.low %v71_v25, %v74_v30  ;;  %v1429_v58 = vcombine.low %v133_v26, %v134_v35 }
  0xa9   :  { %v79_v39 = vpop.permute.xlu0 %78  ;;  %v82_v41 = vpop.permute.xlu1 %81  ;;  %v1431_v59 = vcombine.low %v165_v28, %v166_v36  ;;  %v1436_v4 = vsel %vm981_vm0, %v621_v42, -inf  ;;  %v457_v5 = vrot.slane %v429_v24, %v1352_v16  ;;  %v1439_v11 = vcombine.low %v436_v22, %v443_v43 }
  0xaa   :  { %v280_v51 = vcombine.low %v76_v17, %v79_v39  ;;  %v80_v56 = vrot.slane %v79_v39, 1  ;;  %v278_v57 = vcombine.low %v270_v20, %v277_v33  ;;  %v136_v60 = vrot.slane %v79_v39, 2 }
  0xab   :  { %v168_v62 = vrot.slane %v79_v39, 3  ;;  %v83_v6 = vrot.slane %v82_v41, 1  ;;  %v137_v8 = vrot.slane %v82_v41, 2  ;;  %v169_v14 = vrot.slane %v82_v41, 3 }
  0xac   :  { %v296_v49 = vrot.slane %v280_v51, %v1352_v16  ;;  %v985_v63 = vsel %vm981_vm0, %v278_v57, -inf  ;;  %v476_v13 = vcombine.low %v77_v46, %v80_v56  ;;  %v672_v17 = vcombine.low %v135_v47, %v136_v60 }
  0xad   :  { %v85_v0 = vpop.permute.xlu0 %84  ;;  %v88_v1 = vpop.permute.xlu1 %87  ;;  %986 = vmax.xlane.f32.xlu0 %v985_v63  ;;  %v1441_v20 = vcombine.low %v167_v50, %v168_v62  ;;  %v485_v25 = vrot.slane %v475_v55, %v1352_v16  ;;  %v681_v31 = vrot.slane %v1429_v58, %v1352_v16  ;;  %v1448_v22 = vcombine.low %v450_v45, %v457_v5 }
  0xae   :  { %v86_v9 = vrot.slane %v85_v0, 1  ;;  %v138_v15 = vrot.slane %v85_v0, 2  ;;  %v281_v19 = vcombine.low %v82_v41, %v85_v0  ;;  %v170_v21 = vrot.slane %v85_v0, 3 }
  0xaf   :  { %v89_v26 = vrot.slane %v88_v1, 1  ;;  %v311_v24 = vcombine.low %v289_v52, %v296_v49  ;;  %v139_v35 = vrot.slane %v88_v1, 2  ;;  %v171_v42 = vrot.slane %v88_v1, 3 }
  0xb0   :  { %v477_v32 = vcombine.low %v83_v6, %v86_v9  ;;  %v303_v41 = vrot.slane %v281_v19, %v1352_v16  ;;  %v673_v33 = vcombine.low %v137_v8, %v138_v15  ;;  %v1451_v46 = vcombine.low %v169_v14, %v170_v21 }
  0xb1   :  { %v91_v28 = vpop.permute.xlu0 %90  ;;  %v1444_v30 = vpop.permute.xlu1 %93  ;;  %v492_v51 = vrot.slane %v476_v13, %v1352_v16  ;;  %v319_v56 = vrot.slane %v311_v24, %v1352_v16  ;;  %v688_v57 = vrot.slane %v672_v17, %v1352_v16  ;;  %v466_v58 = vrot.slane %v1439_v11, %v1352_v16 }
  0xb2   :  { %v92_v36 = vrot.slane %v91_v28, 1  ;;  %v282_v39 = vcombine.low %v88_v1, %v91_v28  ;;  %v140_v43 = vrot.slane %v91_v28, 2  ;;  %v172_v47 = vrot.slane %v91_v28, 3 }
  0xb3   :  { %v95_v60 = vrot.slane %v1444_v30, 1  ;;  %v141_v62 = vrot.slane %v1444_v30, 2  ;;  %v499_v63 = vrot.slane %v477_v32, %v1352_v16  ;;  %v507_v13 = vcombine.low %v485_v25, %v492_v51 }
  0xb4   :  { %v310_v50 = vrot.slane %v282_v39, %v1352_v16  ;;  %v478_v52 = vcombine.low %v89_v26, %v92_v36  ;;  %v674_v0 = vcombine.low %v139_v35, %v140_v43  ;;  %v1468_v8 = vcombine.low %v171_v42, %v172_v47 }
  0xb5   :  { %v1455_v55 = vpop.permute.xlu0 %96  ;;  %v100_v45 = vpop.permute.xlu1 %99  ;;  %v695_v14 = vrot.slane %v673_v33, %v1352_v16  ;;  %v1476_v26 = vcombine.low %v681_v31, %v688_v57  ;;  %v473_v28 = vrot.slane %v1448_v22, %v1352_v16  ;;  %v801_v11 = vcombine.low %v779_v48, %v786_v2 }
  0xb6   :  { %v98_v1 = vrot.slane %v1455_v55, 1  ;;  %v328_v5 = vcombine.low %v1444_v30, %v1455_v55  ;;  %v312_v6 = vcombine.low %v303_v41, %v310_v50  ;;  %v142_v9 = vrot.slane %v1455_v55, 2 }
  0xb7   :  { %v506_v21 = vrot.slane %v478_v52, %v1352_v16  ;;  %v101_v32 = vrot.slane %v100_v45, 1  ;;  %v143_v35 = vrot.slane %v100_v45, 2  ;;  %v175_v41 = vrot.slane %v100_v45, 3 }
  0xb8   :  { %v326_v17 = vrot.slane %v312_v6, %v1352_v16  ;;  %v338_v25 = vrot.slane %v328_v5, %v1352_v16  ;;  %v1482_v39 = vcombine.low %v95_v60, %v98_v1  ;;  %v1484_v42 = vcombine.low %v141_v62, %v142_v9 }
  0xb9   :  { %v103_v15 = vpop.permute.xlu0 %102  ;;  %v1472_v19 = vpop.permute.xlu1 %105  ;;  %v702_v31 = vrot.slane %v674_v0, %v1352_v16  ;;  %v508_v5 = vcombine.low %v499_v63, %v506_v21  ;;  %v515_v62 = vrot.slane %v507_v13, %v1352_v16  ;;  %v711_v3 = vrot.slane %v1476_v26, %v1352_v16 }
  0xba   :  { %v329_v36 = vcombine.low %v100_v45, %v103_v15  ;;  %v327_v33 = vcombine.low %v319_v56, %v326_v17  ;;  %v104_v43 = vrot.slane %v103_v15, 1  ;;  %v144_v47 = vrot.slane %v103_v15, 2 }
  0xbb   :  { %v176_v50 = vrot.slane %v103_v15, 3  ;;  %v107_v60 = vrot.slane %v1472_v19, 1  ;;  %v145_v45 = vrot.slane %v1472_v19, 2  ;;  %v177_v0 = vrot.slane %v1472_v19, 3 }
  0xbc   :  { %v345_v22 = vrot.slane %v329_v36, %v1352_v16  ;;  %v988_v51 = vsel %vm981_vm0, %v327_v33, -inf  ;;  %v522_v9 = vrot.slane %v508_v5, %v1352_v16  ;;  %v525_v15 = vcombine.low %v101_v32, %v104_v43 }
  0xbd   :  { %v1489_v52 = vpop.permute.xlu0 %108  ;;  %v1491_v57 = vpop.permute.xlu1 %111  ;;  %989 = vmax.xlane.f32.xlu0 %v988_v51  ;;  %v1502_v63 = vcombine.low %v143_v35, %v144_v47  ;;  %v704_v21 = vcombine.low %v695_v14, %v702_v31  ;;  %v1505_v36 = vcombine.low %v175_v41, %v176_v50  ;;  %v474_v31 = vcombine.low %v466_v58, %v473_v28 }
  0xbe   :  { %v110_v56 = vrot.slane %v1489_v52, 1  ;;  %v146_v1 = vrot.slane %v1489_v52, 2  ;;  %v330_v6 = vcombine.low %v1472_v19, %v1489_v52  ;;  %v113_v17 = vrot.slane %v1491_v57, 1 }
  0xbf   :  { %v523_v13 = vcombine.low %v515_v62, %v522_v9  ;;  %v360_v51 = vcombine.low %v338_v25, %v345_v22  ;;  %v178_v49 = vrot.slane %v1489_v52, 3  ;;  %v147_v41 = vrot.slane %v1491_v57, 2 }
  0xc0   :  { %v526_v24 = vcombine.low %v107_v60, %v110_v56  ;;  %v352_v14 = vrot.slane %v330_v6, %v1352_v16  ;;  %v1517_v35 = vcombine.low %v145_v45, %v146_v1  ;;  %v179_v25 = vrot.slane %v1491_v57, 3 }
  0xc1   :  { %v1507_v33 = vpop.permute.xlu0 %114  ;;  %995 = vmax.xlane.f32.xlu0 %v1421_v38  ;;  %v718_v47 = vrot.slane %v704_v21, %v1352_v16  ;;  %v1000_v38 = vsel %vm981_vm0, %v523_v13, -inf  ;;  %v368_v22 = vrot.slane %v360_v51, %v1352_v16  ;;  %v800_v60 = vrot.slane %v1375_v10, %v1352_v16 }
  0xc2   :  { %v116_v5 = vrot.slane %v1507_v33, 1  ;;  %v331_v32 = vcombine.low %v1491_v57, %v1507_v33  ;;  %v148_v50 = vrot.slane %v1507_v33, 2  ;;  %v541_v45 = vrot.slane %v525_v15, %v1352_v16 }
  0xc3   :  { %v548_v56 = vrot.slane %v526_v24, %v1352_v16  ;;  %v802_v58 = vcombine.low %v793_v23, %v800_v60  ;;  %v534_v10 = vrot.slane %v1482_v39, %v1352_v16  ;;  %v884_v28 = vrot.slane %v1441_v20, %v1352_v16 }
  0xc4   :  { %v359_v26 = vrot.slane %v331_v32, %v1352_v16  ;;  %v527_v43 = vcombine.low %v113_v17, %v116_v5  ;;  %v719_v1 = vcombine.low %v711_v3, %v718_v47  ;;  %v877_v40 = vrot.slane %v1431_v59, %v1352_v16 }
  0xc5   :  { %1001 = vmax.xlane.f32.xlu0 %v1000_v38  ;;  %v816_v27 = vrot.slane %v802_v58, %v1352_v16  ;;  %v556_v48 = vcombine.low %v534_v10, %v541_v45  ;;  %v891_v61 = vrot.slane %v1451_v46, %v1352_v16  ;;  %v898_v2 = vrot.slane %v1468_v8, %v1352_v16 }
  0xc6   :  { %v361_v57 = vcombine.low %v352_v14, %v359_v26  ;;  %v555_v62 = vrot.slane %v527_v43, %v1352_v16  ;;  %v180_v23 = vrot.slane %v1507_v33, 3  ;;  %v723_v39 = vcombine.low %v147_v41, %v148_v50 }
  0xc7   :  { %v639_v3 = vrot.slane %v1397_v53, %v1352_v16  ;;  %v809_v59 = vrot.slane %v801_v11, %v1352_v16  ;;  %v899_v15 = vcombine.low %v877_v40, %v884_v28  ;;  %v900_v17 = vcombine.low %v891_v61, %v898_v2 }
  0xc8   :  { %v375_v24 = vrot.slane %v361_v57, %v1352_v16  ;;  %v557_v6 = vcombine.low %v548_v56, %v555_v62  ;;  %v632_v8 = vrot.slane %v1388_v37, %v1352_v16  ;;  %v646_v21 = vrot.slane %v1407_v12, %v1352_v16 }
  0xc9   :  { %1007 = vmax.xlane.f32.xlu0 %v1436_v4  ;;  %v653_v4 = vrot.slane %v1416_v29, %v1352_v16  ;;  %v1012_v53 = vsel %vm981_vm0, %v719_v1, -inf  ;;  %v817_v33 = vcombine.low %v809_v59, %v816_v27  ;;  %v564_v13 = vrot.slane %v556_v48, %v1352_v16 }
  0xca   :  { %v376_v20 = vcombine.low %v368_v22, %v375_v24  ;;  %v571_v9 = vrot.slane %v557_v6, %v1352_v16  ;;  %v914_v51 = vrot.slane %v900_v17, %v1352_v16  ;;  %v997_v5 = vsel %vm981_vm0, %v474_v31, -inf }
  0xcb   :  { %v654_v32 = vcombine.low %v632_v8, %v639_v3  ;;  %v655_v14 = vcombine.low %v646_v21, %v653_v4  ;;  %v737_v37 = vrot.slane %v1502_v63, %v1352_v16  ;;  %v907_v41 = vrot.slane %v899_v15, %v1352_v16 }
  0xcc   :  { %v991_v46 = vsel %vm981_vm0, %v376_v20, -inf  ;;  %v572_v12 = vcombine.low %v564_v13, %v571_v9  ;;  %v744_v29 = vrot.slane %v1517_v35, %v1352_v16  ;;  %v751_v26 = vrot.slane %v723_v39, %v1352_v16 }
  0xcd   :  { %992 = vmax.xlane.f32.xlu1 %v991_v46  ;;  %1013 = vmax.xlane.f32.xlu0 %v1012_v53  ;;  %v919_v43 = vcombine.low %v179_v25, %v180_v23  ;;  %v669_v47 = vrot.slane %v655_v14, %v1352_v16  ;;  %v730_v50 = vrot.slane %v1484_v42, %v1352_v16  ;;  %v1018_v38 = vsel %vm981_vm0, %v817_v33, -inf }
  0xce   :  { %v849_v31 = vrot.slane %v1418_v34, %v1352_v16  ;;  %v918_v63 = vcombine.low %v177_v0, %v178_v49  ;;  %v915_v35 = vcombine.low %v907_v41, %v914_v51  ;;  %v753_v22 = vcombine.low %v744_v29, %v751_v26 }
  0xcf   :  { %v662_v25 = vrot.slane %v654_v32, %v1352_v16  ;;  %v752_v60 = vcombine.low %v730_v50, %v737_v37  ;;  %v835_v42 = vrot.slane %v1399_v54, %v1352_v16  ;;  %v842_v34 = vrot.slane %v1410_v18, %v1352_v16 }
  0xd0   :  { %v1666_v52 = vrot.slane %v1455_v55, 3  ;;  %v1667_v19 = vrot.slane %v1444_v30, 3  ;;  %v1003_v0 = vsel %vm981_vm0, %v572_v12, -inf  ;;  %v828_v57 = vrot.slane %v1392_v44, %v1352_v16 }
  0xd1   :  { %998 = vmax.xlane.f32.xlu1 %v997_v5  ;;  %1019 = vmax.xlane.f32.xlu0 %v1018_v38  ;;  %v670_v45 = vcombine.low %v662_v25, %v669_v47  ;;  %v767_v56 = vrot.slane %v753_v22, %v1352_v16  ;;  %v851_v62 = vcombine.low %v842_v34, %v849_v31  ;;  %v1024_v54 = vsel %vm981_vm0, %v915_v35, -inf }
  0xd2   :  { %v916_v49 = vcombine.low %v1667_v19, %v1666_v52  ;;  %v947_v11 = vrot.slane %v919_v43, %v1352_v16  ;;  %v760_v18 = vrot.slane %v752_v60, %v1352_v16  ;;  %v850_v55 = vcombine.low %v828_v57, %v835_v42 }
  0xd3   :  { %v933_v30 = vrot.slane %v1505_v36, %v1352_v16  ;;  %v940_v58 = vrot.slane %v918_v63, %v1352_v16  ;;  %v1009_v10 = vsel %vm981_vm0, %v670_v45, -inf  ;;  %v865_v24 = vrot.slane %v851_v62, %v1352_v16 }
  0xd4   :  { %v926_v44 = vrot.slane %v916_v49, %v1352_v16  ;;  %v768_v28 = vcombine.low %v760_v18, %v767_v56  ;;  %v858_v6 = vrot.slane %v850_v55, %v1352_v16  ;;  %v1668_v59 = vlaneseq }
  0xd5   :  { %1004 = vmax.xlane.f32.xlu1 %v1003_v0  ;;  %1025 = vmax.xlane.f32.xlu0 %v1024_v54  ;;  %v949_v1 = vcombine.low %v940_v58, %v947_v11 }
  0xd6   :  { %v948_v40 = vcombine.low %v926_v44, %v933_v30  ;;  %v1015_v27 = vsel %vm981_vm0, %v768_v28, -inf  ;;  %v866_v48 = vcombine.low %v858_v6, %v865_v24  ;;  %v1617_v9 = vand.u32 127, %v1668_v59 }
  0xd7   :  { %v963_v61 = vrot.slane %v949_v1, %v1352_v16 }
  0xd8   :  { %v956_v36 = vrot.slane %v948_v40, %v1352_v16  ;;  %v1021_v2 = vsel %vm981_vm0, %v866_v48, -inf  ;;  %v1052_v15 = vadd.s32 4294967288, %v1617_v9  ;;  %v1059_v17 = vadd.s32 4294967280, %v1617_v9 }
  0xd9   :  { %1010 = vmax.xlane.f32.xlu1 %v1009_v10  ;;  %v1066_v16 = vadd.s32 4294967272, %v1617_v9  ;;  %v1050_v4 = vsub.s32 %v1617_v9, %v1346_v7  ;;  %v1073_v33 = vadd.s32 4294967264, %v1617_v9  ;;  %v1080_v32 = vadd.s32 4294967256, %v1617_v9 }
  0xda   :  { %v964_v23 = vcombine.low %v956_v36, %v963_v61  ;;  %v1055_v8 = vsub.s32 %v1052_v15, %v1346_v7  ;;  %v1062_v21 = vsub.s32 %v1059_v17, %v1346_v7  ;;  %v1087_v41 = vadd.s32 4294967248, %v1617_v9 }
  0xdb   :  { %v1069_v5 = vsub.s32 %v1066_v16, %v1346_v7  ;;  %v1076_v12 = vsub.s32 %v1073_v33, %v1346_v7  ;;  %v1083_v47 = vsub.s32 %v1080_v32, %v1346_v7  ;;  %v1094_v50 = vadd.s32 4294967240, %v1617_v9 }
  0xdc   :  { %v1027_v39 = vsel %vm981_vm0, %v964_v23, -inf  ;;  %v1090_v22 = vsub.s32 %v1087_v41, %v1346_v7  ;;  %v1101_v25 = vadd.s32 4294967232, %v1617_v9  ;;  %v1108_v52 = vadd.s32 4294967224, %v1617_v9 }
  0xdd   :  { %1016 = vmax.xlane.f32.xlu1 %v1015_v27  ;;  %v1097_v34 = vsub.s32 %v1094_v50, %v1346_v7  ;;  %v1115_v45 = vadd.s32 4294967216, %v1617_v9  ;;  %v1122_v18 = vadd.s32 4294967208, %v1617_v9  ;;  %v1129_v10 = vadd.s32 4294967200, %v1617_v9 }
  0xde   :  { %v1104_v57 = vsub.s32 %v1101_v25, %v1346_v7  ;;  %v1111_v54 = vsub.s32 %v1108_v52, %v1346_v7  ;;  %v1136_v6 = vadd.s32 4294967192, %v1617_v9 }
  0xdf   :  { %v1118_v44 = vsub.s32 %v1115_v45, %v1346_v7  ;;  %v1125_v1 = vsub.s32 %v1122_v18, %v1346_v7  ;;  %v1132_v36 = vsub.s32 %v1129_v10, %v1346_v7 }
  0xe1   :  { %1022 = vmax.xlane.f32.xlu1 %v1021_v2  ;;  %v1143_v2 = vadd.s32 4294967184, %v1617_v9 }
  0xe5   :  { %1028 = vmax.xlane.f32.xlu1 %v1027_v39 }
 0x12a   :  { %v984_v53 = vpop.xlane.xlu1 %983 }
 0x12b   :  { %v1051_v37 = vrot.slane %v984_v53, %v1050_v4 }
 0x13a   :  { %v987_v20 = vpop.xlane.xlu0 %986 }
 0x13b   :  { %v1056_v13 = vrot.slane %v987_v20, %v1055_v8  ;;  %v1139_v20 = vsub.s32 %v1136_v6, %v1346_v7 }
 0x13d   :  { %v1058_v26 = vsel %vm1057_vm1, %v1056_v13, %v1051_v37 }
 0x14a   :  { %v990_v3 = vpop.xlane.xlu0 %989 }
 0x14b   :  { %v1063_v14 = vrot.slane %v990_v3, %v1062_v21  ;;  %v1150_v3 = vadd.s32 4294967176, %v1617_v9 }
 0x14d   :  { %v1065_v31 = vsel %vm1064_vm2, %v1063_v14, %v1058_v26  ;;  %v1153_v4 = vsub.s32 %v1150_v3, %v1346_v7 }
 0x14e   :  { %v996_v46 = vpop.xlane.xlu0 %995 }
 0x14f   :  { %v1077_v35 = vrot.slane %v996_v46, %v1076_v12  ;;  %v1146_v46 = vsub.s32 %v1143_v2, %v1346_v7 }
 0x152   :  { %v1002_v51 = vpop.xlane.xlu0 %1001 }
 0x153   :  { %v1091_v0 = vrot.slane %v1002_v51, %v1090_v22 }
 0x156   :  { %v1008_v63 = vpop.xlane.xlu0 %1007 }
 0x157   :  { %v1105_v58 = vrot.slane %v1008_v63, %v1104_v57 }
 0x15a   :  { %v993_v29 = vpop.xlane.xlu1 %992  ;;  %v1014_v62 = vpop.xlane.xlu0 %1013 }
 0x15b   :  { %v1070_v43 = vrot.slane %v993_v29, %v1069_v5  ;;  %v1119_v61 = vrot.slane %v1014_v62, %v1118_v44 }
 0x15d   :  { %v1072_v38 = vsel %vm1071_vm3, %v1070_v43, %v1065_v31 }
 0x15e   :  { %v999_v60 = vpop.xlane.xlu1 %998  ;;  %v1079_v19 = vsel %vm1078_vm4, %v1077_v35, %v1072_v38  ;;  %v1020_v27 = vpop.xlane.xlu0 %1019 }
 0x15f   :  { %v1084_v42 = vrot.slane %v999_v60, %v1083_v47  ;;  %v1133_v17 = vrot.slane %v1020_v27, %v1132_v36 }
 0x161   :  { %v1086_v49 = vsel %vm1085_vm5, %v1084_v42, %v1079_v19 }
 0x162   :  { %v1005_v56 = vpop.xlane.xlu1 %1004  ;;  %v1093_v55 = vsel %vm1092_vm6, %v1091_v0, %v1086_v49  ;;  %v1026_v16 = vpop.xlane.xlu0 %1025 }
 0x163   :  { %v1098_v11 = vrot.slane %v1005_v56, %v1097_v34  ;;  %v1147_v13 = vrot.slane %v1026_v16, %v1146_v46 }
 0x165   :  { %v1100_v30 = vsel %vm1099_vm7, %v1098_v11, %v1093_v55 }
 0x166   :  { %v1011_v28 = vpop.xlane.xlu1 %1010  ;;  %v1107_v40 = vsel %vm1106_vm8, %v1105_v58, %v1100_v30 }
 0x167   :  { %v1112_v24 = vrot.slane %v1011_v28, %v1111_v54 }
 0x169   :  { %v1114_v48 = vsel %vm1113_vm9, %v1112_v24, %v1107_v40 }
 0x16a   :  { %v1017_v23 = vpop.xlane.xlu1 %1016  ;;  %v1121_v59 = vsel %vm1120_vm10, %v1119_v61, %v1114_v48 }
 0x16b   :  { %v1126_v39 = vrot.slane %v1017_v23, %v1125_v1 }
 0x16d   :  { %v1128_v15 = vsel %vm1127_vm11, %v1126_v39, %v1121_v59 }
 0x16e   :  { %v1023_v8 = vpop.xlane.xlu1 %1022  ;;  %v1135_v53 = vsel %vm1134_vm12, %v1133_v17, %v1128_v15 }
 0x16f   :  { %v1140_v21 = vrot.slane %v1023_v8, %v1139_v20 }
 0x171   :  { %v1142_v33 = vsel %vm1141_vm13, %v1140_v21, %v1135_v53 }
 0x172   :  { %v1029_v51 = vpop.xlane.xlu1 %1028  ;;  %v1149_v5 = vsel %vm1148_vm14, %v1147_v13, %v1142_v33 }
 0x173   :  { %v1154_v9 = vrot.slane %v1029_v51, %v1153_v4 }
 0x175   :  { %v1156_v32 = vsel %vm1155_vm15, %v1154_v9, %v1149_v5 }
 0x176   :  { %1158 = vst [vmem:[#allocation5] sm:$0x1] %v1156_v32 }
 0x177   :  { %1241 = shalt.err (!%p1238_p12)
}
 0x178   :  { %s1242_s24 = scalar_lea.hbm %s1664_s1, 16 }
 0x179   :  { %p1243_p13 = scmp.ne.s32.totalorder %s1664_s1, %s1242_s24  ;;  %p1246_p0 = scmp.lt.u32.totalorder %s1242_s24, %s1664_s1 }
 0x17b   :  { %p1248_p1 = pnand %p1246_p0, %p1243_p13 }
 0x17d   :  { %1251 = shalt.err (!%p1248_p1)
}
 0x17e   :  { %1168 = dma.vmem_to_hbm [thread:$0]  %s1166_s20, 16, %s1664_s1, [#allocation4]  }
 0x17f   :  { %1254 = dma.done.wait [#allocation4], 16  }
 0x180   :  { %1255 = vsyncadd [#allocation4], 4294967280 }
 0x181   :  { %1172 = vsyncpa [#allocation3], 1 }
 0x182   :  { %1173 = vsyncpa [#allocation4], 1 }

</bundles_post_ra>
